<compile_context>
chip_gen: v7x
topology: tpu7x:2x2x1
jax: 0.10.0
libtpu: 0.0.40
codegen_flags: <defaults>
</compile_context>

<pallas_src>
import math

import jax
import jax.numpy as jnp
from jax import lax
from jax.experimental import pallas as pl
from jax.experimental.pallas import tpu as pltpu

# ----- model hyper-parameters (the globals the torch module refers to) -----
d_model = 32
d_k = 8
d_v = 8
n_heads = 4
d_ff = 64
EPS = 1e-5  # nn.LayerNorm default


def _layer_norm(x, gamma, beta):
    mu = jnp.mean(x, axis=-1, keepdims=True)
    var = jnp.mean((x - mu) ** 2, axis=-1, keepdims=True)
    return (x - mu) * jax.lax.rsqrt(var + EPS) * gamma + beta


def encoder_layer_kernel(
    x_ref,       # (B*S, d_model)
    bias_ref,    # (B*n_heads*S, S) additive attention-mask bias (0 or -1e9)
    wqkv_ref,    # (d_model, 3*n_heads*d_k) fused [Wq | Wk | Wv]
    wo_ref,      # (n_heads, d_v, d_model) head-stacked output projection
    wc1_ref,     # (d_model, d_ff)
    wc2_ref,     # (d_ff, d_model)
    vec_ref,     # (8, 128) packed bias / LayerNorm vectors
    out_ref,     # (B*S, d_model)
    attn_ref,    # (B*n_heads*S, S) flat attention probs
):
    S = bias_ref.shape[1]
    B = x_ref.shape[0] // S

    x = x_ref[...]                                       # (B*S, d_model)

    bqkv = vec_ref[0:1, 0:3 * n_heads * d_k]             # (1, 96)
    bo = vec_ref[1:2, 0:d_model]
    ln1g = vec_ref[2:3, 0:d_model]
    ln1b = vec_ref[3:4, 0:d_model]
    bc1 = vec_ref[4:5, 0:d_ff]
    bc2 = vec_ref[5:6, 0:d_model]
    ln2g = vec_ref[6:7, 0:d_model]
    ln2b = vec_ref[7:8, 0:d_model]

    # --- fused QKV projection: one MXU push, (B*S, 3*H*d_k) ---
    qkv = jnp.dot(x, wqkv_ref[...], preferred_element_type=jnp.float32) + bqkv

    inv_sqrt_dk = jnp.float32(1.0 / math.sqrt(d_k))

    # --- scores for every (b, h), sublane-stacked into one (B*H*S, S) slab ---
    # Q·K^T via dot_general contracting the last dims: no kh.T materialization.
    score_tiles = []
    for b in range(B):
        rows = slice(b * S, (b + 1) * S)                 # static sublane slice
        for h in range(n_heads):
            qh = qkv[rows, h * d_k:(h + 1) * d_k]
            kh = qkv[rows, (n_heads + h) * d_k:(n_heads + h + 1) * d_k]
            s = lax.dot_general(
                qh, kh,
                dimension_numbers=(((1,), (1,)), ((), ())),
                preferred_element_type=jnp.float32,
            )
            score_tiles.append(s * inv_sqrt_dk)
    scores = jnp.concatenate(score_tiles, axis=0) + bias_ref[...]   # (B*H*S, S)

    # --- single batched softmax over the stacked slab ---
    m = jnp.max(scores, axis=-1, keepdims=True)
    e = jnp.exp(scores - m)
    p = e * pl.reciprocal(jnp.sum(e, axis=-1, keepdims=True), approx=True)
    attn_ref[...] = p                                    # one contiguous store

    # --- heads outer / batches inner: merge ctx·W_O across the batch ---
    mha = None
    for h in range(n_heads):
        ctx_parts = []
        for b in range(B):
            rows_p = slice((b * n_heads + h) * S, (b * n_heads + h + 1) * S)
            rows_v = slice(b * S, (b + 1) * S)
            vh = qkv[rows_v, (2 * n_heads + h) * d_v:(2 * n_heads + h + 1) * d_v]
            ctx_parts.append(
                jnp.dot(p[rows_p], vh, preferred_element_type=jnp.float32))
        ctx = jnp.concatenate(ctx_parts, axis=0)         # (B*S, d_v)
        contrib = jnp.dot(ctx, wo_ref[h], preferred_element_type=jnp.float32)
        mha = contrib if mha is None else mha + contrib  # straight acc chain (MRB-friendly)
    mha = mha + bo                                       # (B*S, d_model)

    # --- residual + LayerNorm 1 ---
    y = _layer_norm(mha + x, ln1g, ln1b)

    # --- position-wise FFN (Conv1d kernel_size=1 == Linear) ---
    h1 = jnp.dot(y, wc1_ref[...], preferred_element_type=jnp.float32) + bc1
    h1 = jnp.maximum(h1, jnp.float32(0.0))
    f = jnp.dot(h1, wc2_ref[...], preferred_element_type=jnp.float32) + bc2

    # --- residual + LayerNorm 2 ---
    out_ref[...] = _layer_norm(f + y, ln2g, ln2b)


def init_params(key):
    ks = jax.random.split(key, 12)
    scale = 0.02
    p = {
        # stored as [in, out] (already transposed relative to nn.Linear weight)
        "wq": jax.random.normal(ks[0], (d_model, d_k * n_heads), jnp.float32) * scale,
        "bq": jax.random.normal(ks[1], (1, d_k * n_heads), jnp.float32) * scale,
        "wk": jax.random.normal(ks[2], (d_model, d_k * n_heads), jnp.float32) * scale,
        "bk": jax.random.normal(ks[3], (1, d_k * n_heads), jnp.float32) * scale,
        "wv": jax.random.normal(ks[4], (d_model, d_v * n_heads), jnp.float32) * scale,
        "bv": jax.random.normal(ks[5], (1, d_v * n_heads), jnp.float32) * scale,
        "wo": jax.random.normal(ks[6], (n_heads * d_v, d_model), jnp.float32) * scale,
        "bo": jax.random.normal(ks[7], (1, d_model), jnp.float32) * scale,
        "ln1_g": jnp.ones((1, d_model), jnp.float32),
        "ln1_b": jnp.zeros((1, d_model), jnp.float32),
        # conv1: (d_ff, d_model, 1) -> linear [d_model, d_ff]
        "wc1": jax.random.normal(ks[8], (d_model, d_ff), jnp.float32) * scale,
        "bc1": jax.random.normal(ks[9], (1, d_ff), jnp.float32) * scale,
        # conv2: (d_model, d_ff, 1) -> linear [d_ff, d_model]
        "wc2": jax.random.normal(ks[10], (d_ff, d_model), jnp.float32) * scale,
        "bc2": jax.random.normal(ks[11], (1, d_model), jnp.float32) * scale,
        "ln2_g": jnp.ones((1, d_model), jnp.float32),
        "ln2_b": jnp.zeros((1, d_model), jnp.float32),
    }
    return p


def _pack_params(params):
    """Fuse QKV weights, head-stack W_O and pack all small vectors into one slab."""
    wqkv = jnp.concatenate([params["wq"], params["wk"], params["wv"]], axis=1)  # (d_model, 96)
    wo_h = params["wo"].reshape(n_heads, d_v, d_model)
    vecs = jnp.zeros((8, 128), jnp.float32)
    vecs = vecs.at[0, :3 * n_heads * d_k].set(
        jnp.concatenate([params["bq"][0], params["bk"][0], params["bv"][0]]))
    vecs = vecs.at[1, :d_model].set(params["bo"][0])
    vecs = vecs.at[2, :d_model].set(params["ln1_g"][0])
    vecs = vecs.at[3, :d_model].set(params["ln1_b"][0])
    vecs = vecs.at[4, :d_ff].set(params["bc1"][0])
    vecs = vecs.at[5, :d_model].set(params["bc2"][0])
    vecs = vecs.at[6, :d_model].set(params["ln2_g"][0])
    vecs = vecs.at[7, :d_model].set(params["ln2_b"][0])
    return wqkv, wo_h, params["wc1"], params["wc2"], vecs


@jax.jit
def encoder_layer(enc_inputs, attn_mask, params):
    B, S, _ = enc_inputs.shape
    x2d = enc_inputs.reshape(B * S, d_model)
    # Additive mask bias computed once here and pre-broadcast to the stacked
    # (B*H*S, S) softmax layout (no per-head compare/select in the kernel).
    bias = jnp.where(attn_mask > 0, jnp.float32(-1e9), jnp.float32(0.0))     # (B,S,S)
    bias_slab = jnp.broadcast_to(
        bias[:, None, :, :], (B, n_heads, S, S)).reshape(B * n_heads * S, S)
    wqkv, wo_h, wc1, wc2, vecs = _pack_params(params)

    vmem_spec = pl.BlockSpec(memory_space=pltpu.MemorySpace.VMEM)

    out2d, attn2d = pl.pallas_call(
        encoder_layer_kernel,
        out_shape=(
            jax.ShapeDtypeStruct((B * S, d_model), jnp.float32),
            jax.ShapeDtypeStruct((B * n_heads * S, S), jnp.float32),
        ),
        in_specs=[vmem_spec] * 7,
        out_specs=(vmem_spec, vmem_spec),
        # No grid: the whole layer is a few microseconds of work, so a single
        # invocation avoids per-step pipeline overhead entirely.
    )(x2d, bias_slab, wqkv, wo_h, wc1, wc2, vecs)

    # TODO(synk): on v7x (2 TensorCores/chip) add a 2-wide "parallel" batch
    # grid so each core takes one batch; v5e/v6e (1 TC) keep the zero-overhead
    # fold used here.
    # TODO(synk): at realistic sequence lengths, tile attention over query
    # blocks (grid over S, VMEM accumulator), add a row-block grid for the
    # QKV/FFN matmuls (tm=128 on v5e, 256 on v6e/v7x), cast the big matmul
    # operands to bf16, and stream or drop the probs output to stay within
    # VMEM (64 MiB on v7x, 32 MiB scoped default on v6e).
    return out2d.reshape(B, S, d_model), attn2d.reshape(B, n_heads, S, S)


def encoder_layer_ref(enc_inputs, attn_mask, params):
    """Pure-JAX reference mirroring the torch module."""
    x = enc_inputs
    B, S, _ = x.shape
    q = x @ params["wq"] + params["bq"][0]
    k = x @ params["wk"] + params["bk"][0]
    v = x @ params["wv"] + params["bv"][0]
    q = q.reshape(B, S, n_heads, d_k).transpose(0, 2, 1, 3)
    k = k.reshape(B, S, n_heads, d_k).transpose(0, 2, 1, 3)
    v = v.reshape(B, S, n_heads, d_v).transpose(0, 2, 1, 3)
    scores = jnp.einsum("bhqd,bhkd->bhqk", q, k) / math.sqrt(d_k)
    scores = jnp.where(attn_mask[:, None, :, :] > 0, -1e9, scores)
    attn = jax.nn.softmax(scores, axis=-1)
    ctx = jnp.einsum("bhqk,bhkd->bhqd", attn, v)
    ctx = ctx.transpose(0, 2, 1, 3).reshape(B, S, n_heads * d_v)
    mha = ctx @ params["wo"] + params["bo"][0]
    y = _layer_norm(mha + x, params["ln1_g"][0], params["ln1_b"][0])
    h = jnp.maximum(y @ params["wc1"] + params["bc1"][0], 0.0)
    f = h @ params["wc2"] + params["bc2"][0]
    out = _layer_norm(f + y, params["ln2_g"][0], params["ln2_b"][0])
    return out, attn


if __name__ == "__main__":
    key = jax.random.PRNGKey(0)
    k_x, k_p = jax.random.split(key)

    B, S = 2, 8
    enc_inputs = jax.random.normal(k_x, (B, S, d_model), jnp.float32)

    # mask out the last two key positions (as if padding) for every query
    pad = jnp.zeros((B, S), jnp.float32).at[:, -2:].set(1.0)
    attn_mask = jnp.broadcast_to(pad[:, None, :], (B, S, S)).astype(jnp.float32)

    params = init_params(k_p)

    out, attn = encoder_layer(enc_inputs, attn_mask, params)
    jax.block_until_ready((out, attn))

    out_ref, attn_ref = encoder_layer_ref(enc_inputs, attn_mask, params)
    # Tolerances allow for the EUP approximate reciprocal in the softmax
    # (attention rows sum to 1 only to ~1e-3 -- intended behavior).
    assert jnp.allclose(out, out_ref, atol=2e-3, rtol=2e-3)
    assert jnp.allclose(attn, attn_ref, atol=2e-3, rtol=2e-3)

    print("KERNEL_OK")
</pallas_src>

<mosaic_0001>
module attributes {stable_mosaic.version = 11 : i64} {
  func.func @encoder_layer_kernel(%arg0: memref<16x32xf32, #tpu.memory_space<vmem>>, %arg1: memref<64x8xf32, #tpu.memory_space<vmem>>, %arg2: memref<32x96xf32, #tpu.memory_space<vmem>>, %arg3: memref<4x8x32xf32, #tpu.memory_space<vmem>>, %arg4: memref<32x64xf32, #tpu.memory_space<vmem>>, %arg5: memref<64x32xf32, #tpu.memory_space<vmem>>, %arg6: memref<8x128xf32, #tpu.memory_space<vmem>>, %arg7: memref<16x32xf32, #tpu.memory_space<vmem>>, %arg8: memref<64x8xf32, #tpu.memory_space<vmem>>) attributes {dimension_semantics = [], scalar_prefetch = 0 : i64, scratch_operands = 0 : i64, tpu.core_type = #tpu.core_type<tc>} {
    %c0 = arith.constant 0 : index
    %c0_0 = arith.constant 0 : index
    %0 = vector.load %arg0[%c0, %c0_0] : memref<16x32xf32, #tpu.memory_space<vmem>>, vector<16x32xf32>
    %c0_1 = arith.constant 0 : index
    %c0_2 = arith.constant 0 : index
    %1 = vector.load %arg6[%c0_1, %c0_2] : memref<8x128xf32, #tpu.memory_space<vmem>>, vector<1x96xf32>
    %c1 = arith.constant 1 : index
    %c0_3 = arith.constant 0 : index
    %2 = vector.load %arg6[%c1, %c0_3] : memref<8x128xf32, #tpu.memory_space<vmem>>, vector<1x32xf32>
    %c2 = arith.constant 2 : index
    %c0_4 = arith.constant 0 : index
    %3 = vector.load %arg6[%c2, %c0_4] : memref<8x128xf32, #tpu.memory_space<vmem>>, vector<1x32xf32>
    %c3 = arith.constant 3 : index
    %c0_5 = arith.constant 0 : index
    %4 = vector.load %arg6[%c3, %c0_5] : memref<8x128xf32, #tpu.memory_space<vmem>>, vector<1x32xf32>
    %c4 = arith.constant 4 : index
    %c0_6 = arith.constant 0 : index
    %5 = vector.load %arg6[%c4, %c0_6] : memref<8x128xf32, #tpu.memory_space<vmem>>, vector<1x64xf32>
    %c5 = arith.constant 5 : index
    %c0_7 = arith.constant 0 : index
    %6 = vector.load %arg6[%c5, %c0_7] : memref<8x128xf32, #tpu.memory_space<vmem>>, vector<1x32xf32>
    %c6 = arith.constant 6 : index
    %c0_8 = arith.constant 0 : index
    %7 = vector.load %arg6[%c6, %c0_8] : memref<8x128xf32, #tpu.memory_space<vmem>>, vector<1x32xf32>
    %c7 = arith.constant 7 : index
    %c0_9 = arith.constant 0 : index
    %8 = vector.load %arg6[%c7, %c0_9] : memref<8x128xf32, #tpu.memory_space<vmem>>, vector<1x32xf32>
    %c0_10 = arith.constant 0 : index
    %c0_11 = arith.constant 0 : index
    %9 = vector.load %arg2[%c0_10, %c0_11] : memref<32x96xf32, #tpu.memory_space<vmem>>, vector<32x96xf32>
    %cst = arith.constant dense<0.000000e+00> : vector<16x96xf32>
    %10 = tpu.matmul %0, %9, %cst {dimension_numbers = #tpu.dot_dimension_numbers<[1], [0], [0], [1], [0, 0, 1, 1], [], []>} : vector<16x32xf32>, vector<32x96xf32>, vector<16x96xf32> -> vector<16x96xf32>
    %11 = vector.broadcast %1 : vector<1x96xf32> to vector<16x96xf32>
    %12 = arith.addf %10, %11 : vector<16x96xf32>
    %13 = vector.extract_strided_slice %12 {offsets = [0, 0], sizes = [8, 8], strides = [1, 1]} : vector<16x96xf32> to vector<8x8xf32>
    %14 = vector.extract_strided_slice %12 {offsets = [0, 32], sizes = [8, 8], strides = [1, 1]} : vector<16x96xf32> to vector<8x8xf32>
    %cst_12 = arith.constant dense<0.000000e+00> : vector<8x8xf32>
    %15 = tpu.matmul %13, %14, %cst_12 {dimension_numbers = #tpu.dot_dimension_numbers<[1], [1], [0], [0], [0, 0, 1, 0], [], []>} : vector<8x8xf32>, vector<8x8xf32>, vector<8x8xf32> -> vector<8x8xf32>
    %cst_13 = arith.constant 0.353553385 : f32
    %16 = vector.broadcast %cst_13 : f32 to vector<8x8xf32>
    %17 = arith.mulf %15, %16 : vector<8x8xf32>
    %18 = vector.extract_strided_slice %12 {offsets = [0, 8], sizes = [8, 8], strides = [1, 1]} : vector<16x96xf32> to vector<8x8xf32>
    %19 = vector.extract_strided_slice %12 {offsets = [0, 40], sizes = [8, 8], strides = [1, 1]} : vector<16x96xf32> to vector<8x8xf32>
    %cst_14 = arith.constant dense<0.000000e+00> : vector<8x8xf32>
    %20 = tpu.matmul %18, %19, %cst_14 {dimension_numbers = #tpu.dot_dimension_numbers<[1], [1], [0], [0], [0, 0, 1, 0], [], []>} : vector<8x8xf32>, vector<8x8xf32>, vector<8x8xf32> -> vector<8x8xf32>
    %cst_15 = arith.constant 0.353553385 : f32
    %21 = vector.broadcast %cst_15 : f32 to vector<8x8xf32>
    %22 = arith.mulf %20, %21 : vector<8x8xf32>
    %23 = vector.extract_strided_slice %12 {offsets = [0, 16], sizes = [8, 8], strides = [1, 1]} : vector<16x96xf32> to vector<8x8xf32>
    %24 = vector.extract_strided_slice %12 {offsets = [0, 48], sizes = [8, 8], strides = [1, 1]} : vector<16x96xf32> to vector<8x8xf32>
    %cst_16 = arith.constant dense<0.000000e+00> : vector<8x8xf32>
    %25 = tpu.matmul %23, %24, %cst_16 {dimension_numbers = #tpu.dot_dimension_numbers<[1], [1], [0], [0], [0, 0, 1, 0], [], []>} : vector<8x8xf32>, vector<8x8xf32>, vector<8x8xf32> -> vector<8x8xf32>
    %cst_17 = arith.constant 0.353553385 : f32
    %26 = vector.broadcast %cst_17 : f32 to vector<8x8xf32>
    %27 = arith.mulf %25, %26 : vector<8x8xf32>
    %28 = vector.extract_strided_slice %12 {offsets = [0, 24], sizes = [8, 8], strides = [1, 1]} : vector<16x96xf32> to vector<8x8xf32>
    %29 = vector.extract_strided_slice %12 {offsets = [0, 56], sizes = [8, 8], strides = [1, 1]} : vector<16x96xf32> to vector<8x8xf32>
    %cst_18 = arith.constant dense<0.000000e+00> : vector<8x8xf32>
    %30 = tpu.matmul %28, %29, %cst_18 {dimension_numbers = #tpu.dot_dimension_numbers<[1], [1], [0], [0], [0, 0, 1, 0], [], []>} : vector<8x8xf32>, vector<8x8xf32>, vector<8x8xf32> -> vector<8x8xf32>
    %cst_19 = arith.constant 0.353553385 : f32
    %31 = vector.broadcast %cst_19 : f32 to vector<8x8xf32>
    %32 = arith.mulf %30, %31 : vector<8x8xf32>
    %33 = vector.extract_strided_slice %12 {offsets = [8, 0], sizes = [8, 8], strides = [1, 1]} : vector<16x96xf32> to vector<8x8xf32>
    %34 = vector.extract_strided_slice %12 {offsets = [8, 32], sizes = [8, 8], strides = [1, 1]} : vector<16x96xf32> to vector<8x8xf32>
    %cst_20 = arith.constant dense<0.000000e+00> : vector<8x8xf32>
    %35 = tpu.matmul %33, %34, %cst_20 {dimension_numbers = #tpu.dot_dimension_numbers<[1], [1], [0], [0], [0, 0, 1, 0], [], []>} : vector<8x8xf32>, vector<8x8xf32>, vector<8x8xf32> -> vector<8x8xf32>
    %cst_21 = arith.constant 0.353553385 : f32
    %36 = vector.broadcast %cst_21 : f32 to vector<8x8xf32>
    %37 = arith.mulf %35, %36 : vector<8x8xf32>
    %38 = vector.extract_strided_slice %12 {offsets = [8, 8], sizes = [8, 8], strides = [1, 1]} : vector<16x96xf32> to vector<8x8xf32>
    %39 = vector.extract_strided_slice %12 {offsets = [8, 40], sizes = [8, 8], strides = [1, 1]} : vector<16x96xf32> to vector<8x8xf32>
    %cst_22 = arith.constant dense<0.000000e+00> : vector<8x8xf32>
    %40 = tpu.matmul %38, %39, %cst_22 {dimension_numbers = #tpu.dot_dimension_numbers<[1], [1], [0], [0], [0, 0, 1, 0], [], []>} : vector<8x8xf32>, vector<8x8xf32>, vector<8x8xf32> -> vector<8x8xf32>
    %cst_23 = arith.constant 0.353553385 : f32
    %41 = vector.broadcast %cst_23 : f32 to vector<8x8xf32>
    %42 = arith.mulf %40, %41 : vector<8x8xf32>
    %43 = vector.extract_strided_slice %12 {offsets = [8, 16], sizes = [8, 8], strides = [1, 1]} : vector<16x96xf32> to vector<8x8xf32>
    %44 = vector.extract_strided_slice %12 {offsets = [8, 48], sizes = [8, 8], strides = [1, 1]} : vector<16x96xf32> to vector<8x8xf32>
    %cst_24 = arith.constant dense<0.000000e+00> : vector<8x8xf32>
    %45 = tpu.matmul %43, %44, %cst_24 {dimension_numbers = #tpu.dot_dimension_numbers<[1], [1], [0], [0], [0, 0, 1, 0], [], []>} : vector<8x8xf32>, vector<8x8xf32>, vector<8x8xf32> -> vector<8x8xf32>
    %cst_25 = arith.constant 0.353553385 : f32
    %46 = vector.broadcast %cst_25 : f32 to vector<8x8xf32>
    %47 = arith.mulf %45, %46 : vector<8x8xf32>
    %48 = vector.extract_strided_slice %12 {offsets = [8, 24], sizes = [8, 8], strides = [1, 1]} : vector<16x96xf32> to vector<8x8xf32>
    %49 = vector.extract_strided_slice %12 {offsets = [8, 56], sizes = [8, 8], strides = [1, 1]} : vector<16x96xf32> to vector<8x8xf32>
    %cst_26 = arith.constant dense<0.000000e+00> : vector<8x8xf32>
    %50 = tpu.matmul %48, %49, %cst_26 {dimension_numbers = #tpu.dot_dimension_numbers<[1], [1], [0], [0], [0, 0, 1, 0], [], []>} : vector<8x8xf32>, vector<8x8xf32>, vector<8x8xf32> -> vector<8x8xf32>
    %cst_27 = arith.constant 0.353553385 : f32
    %51 = vector.broadcast %cst_27 : f32 to vector<8x8xf32>
    %52 = arith.mulf %50, %51 : vector<8x8xf32>
    %53 = tpu.concatenate %17, %22, %27, %32, %37, %42, %47, %52 in 0 : vector<8x8xf32>, vector<8x8xf32>, vector<8x8xf32>, vector<8x8xf32>, vector<8x8xf32>, vector<8x8xf32>, vector<8x8xf32>, vector<8x8xf32> -> vector<64x8xf32>
    %c0_28 = arith.constant 0 : index
    %c0_29 = arith.constant 0 : index
    %54 = vector.load %arg1[%c0_28, %c0_29] : memref<64x8xf32, #tpu.memory_space<vmem>>, vector<64x8xf32>
    %55 = arith.addf %53, %54 : vector<64x8xf32>
    %cst_30 = arith.constant dense<0xFF800000> : vector<64xf32>
    %56 = vector.multi_reduction <maximumf>, %55, %cst_30 [1] : vector<64x8xf32> to vector<64xf32>
    %57 = vector.shape_cast %56 : vector<64xf32> to vector<64x1xf32>
    %58 = vector.broadcast %57 : vector<64x1xf32> to vector<64x8xf32>
    %59 = arith.subf %55, %58 : vector<64x8xf32>
    %60 = math.exp %59 : vector<64x8xf32>
    %cst_31 = arith.constant dense<0.000000e+00> : vector<64xf32>
    %61 = vector.multi_reduction <add>, %60, %cst_31 [1] : vector<64x8xf32> to vector<64xf32>
    %62 = vector.shape_cast %61 : vector<64xf32> to vector<64x1xf32>
    %63 = tpu.reciprocal %62 {approx = true} : vector<64x1xf32> -> vector<64x1xf32>
    %64 = vector.broadcast %63 : vector<64x1xf32> to vector<64x8xf32>
    %65 = arith.mulf %60, %64 : vector<64x8xf32>
    %c0_32 = arith.constant 0 : index
    %c0_33 = arith.constant 0 : index
    %66 = vector.load %arg8[%c0_32, %c0_33] : memref<64x8xf32, #tpu.memory_space<vmem>>, vector<64x8xf32>
    tpu.vector_store %arg8[%c0_32, %c0_33], %65 {strides = array<i32>} : memref<64x8xf32, #tpu.memory_space<vmem>>, vector<64x8xf32>,
    %67 = vector.extract_strided_slice %12 {offsets = [0, 64], sizes = [8, 8], strides = [1, 1]} : vector<16x96xf32> to vector<8x8xf32>
    %68 = vector.extract_strided_slice %65 {offsets = [0, 0], sizes = [8, 8], strides = [1, 1]} : vector<64x8xf32> to vector<8x8xf32>
    %cst_34 = arith.constant dense<0.000000e+00> : vector<8x8xf32>
    %69 = tpu.matmul %68, %67, %cst_34 {dimension_numbers = #tpu.dot_dimension_numbers<[1], [0], [0], [1], [0, 0, 1, 1], [], []>} : vector<8x8xf32>, vector<8x8xf32>, vector<8x8xf32> -> vector<8x8xf32>
    %70 = vector.extract_strided_slice %12 {offsets = [8, 64], sizes = [8, 8], strides = [1, 1]} : vector<16x96xf32> to vector<8x8xf32>
    %71 = vector.extract_strided_slice %65 {offsets = [32, 0], sizes = [8, 8], strides = [1, 1]} : vector<64x8xf32> to vector<8x8xf32>
    %cst_35 = arith.constant dense<0.000000e+00> : vector<8x8xf32>
    %72 = tpu.matmul %71, %70, %cst_35 {dimension_numbers = #tpu.dot_dimension_numbers<[1], [0], [0], [1], [0, 0, 1, 1], [], []>} : vector<8x8xf32>, vector<8x8xf32>, vector<8x8xf32> -> vector<8x8xf32>
    %73 = tpu.concatenate %69, %72 in 0 : vector<8x8xf32>, vector<8x8xf32> -> vector<16x8xf32>
    %c0_36 = arith.constant 0 : index
    %c0_37 = arith.constant 0 : index
    %c0_38 = arith.constant 0 : index
    %74 = vector.load %arg3[%c0_36, %c0_37, %c0_38] : memref<4x8x32xf32, #tpu.memory_space<vmem>>, vector<1x8x32xf32>
    %75 = vector.shape_cast %74 : vector<1x8x32xf32> to vector<8x32xf32>
    %cst_39 = arith.constant dense<0.000000e+00> : vector<16x32xf32>
    %76 = tpu.matmul %73, %75, %cst_39 {dimension_numbers = #tpu.dot_dimension_numbers<[1], [0], [0], [1], [0, 0, 1, 1], [], []>} : vector<16x8xf32>, vector<8x32xf32>, vector<16x32xf32> -> vector<16x32xf32>
    %77 = vector.extract_strided_slice %12 {offsets = [0, 72], sizes = [8, 8], strides = [1, 1]} : vector<16x96xf32> to vector<8x8xf32>
    %78 = vector.extract_strided_slice %65 {offsets = [8, 0], sizes = [8, 8], strides = [1, 1]} : vector<64x8xf32> to vector<8x8xf32>
    %cst_40 = arith.constant dense<0.000000e+00> : vector<8x8xf32>
    %79 = tpu.matmul %78, %77, %cst_40 {dimension_numbers = #tpu.dot_dimension_numbers<[1], [0], [0], [1], [0, 0, 1, 1], [], []>} : vector<8x8xf32>, vector<8x8xf32>, vector<8x8xf32> -> vector<8x8xf32>
    %80 = vector.extract_strided_slice %12 {offsets = [8, 72], sizes = [8, 8], strides = [1, 1]} : vector<16x96xf32> to vector<8x8xf32>
    %81 = vector.extract_strided_slice %65 {offsets = [40, 0], sizes = [8, 8], strides = [1, 1]} : vector<64x8xf32> to vector<8x8xf32>
    %cst_41 = arith.constant dense<0.000000e+00> : vector<8x8xf32>
    %82 = tpu.matmul %81, %80, %cst_41 {dimension_numbers = #tpu.dot_dimension_numbers<[1], [0], [0], [1], [0, 0, 1, 1], [], []>} : vector<8x8xf32>, vector<8x8xf32>, vector<8x8xf32> -> vector<8x8xf32>
    %83 = tpu.concatenate %79, %82 in 0 : vector<8x8xf32>, vector<8x8xf32> -> vector<16x8xf32>
    %c1_42 = arith.constant 1 : index
    %c0_43 = arith.constant 0 : index
    %c0_44 = arith.constant 0 : index
    %84 = vector.load %arg3[%c1_42, %c0_43, %c0_44] : memref<4x8x32xf32, #tpu.memory_space<vmem>>, vector<1x8x32xf32>
    %85 = vector.shape_cast %84 : vector<1x8x32xf32> to vector<8x32xf32>
    %cst_45 = arith.constant dense<0.000000e+00> : vector<16x32xf32>
    %86 = tpu.matmul %83, %85, %cst_45 {dimension_numbers = #tpu.dot_dimension_numbers<[1], [0], [0], [1], [0, 0, 1, 1], [], []>} : vector<16x8xf32>, vector<8x32xf32>, vector<16x32xf32> -> vector<16x32xf32>
    %87 = arith.addf %76, %86 : vector<16x32xf32>
    %88 = vector.extract_strided_slice %12 {offsets = [0, 80], sizes = [8, 8], strides = [1, 1]} : vector<16x96xf32> to vector<8x8xf32>
    %89 = vector.extract_strided_slice %65 {offsets = [16, 0], sizes = [8, 8], strides = [1, 1]} : vector<64x8xf32> to vector<8x8xf32>
    %cst_46 = arith.constant dense<0.000000e+00> : vector<8x8xf32>
    %90 = tpu.matmul %89, %88, %cst_46 {dimension_numbers = #tpu.dot_dimension_numbers<[1], [0], [0], [1], [0, 0, 1, 1], [], []>} : vector<8x8xf32>, vector<8x8xf32>, vector<8x8xf32> -> vector<8x8xf32>
    %91 = vector.extract_strided_slice %12 {offsets = [8, 80], sizes = [8, 8], strides = [1, 1]} : vector<16x96xf32> to vector<8x8xf32>
    %92 = vector.extract_strided_slice %65 {offsets = [48, 0], sizes = [8, 8], strides = [1, 1]} : vector<64x8xf32> to vector<8x8xf32>
    %cst_47 = arith.constant dense<0.000000e+00> : vector<8x8xf32>
    %93 = tpu.matmul %92, %91, %cst_47 {dimension_numbers = #tpu.dot_dimension_numbers<[1], [0], [0], [1], [0, 0, 1, 1], [], []>} : vector<8x8xf32>, vector<8x8xf32>, vector<8x8xf32> -> vector<8x8xf32>
    %94 = tpu.concatenate %90, %93 in 0 : vector<8x8xf32>, vector<8x8xf32> -> vector<16x8xf32>
    %c2_48 = arith.constant 2 : index
    %c0_49 = arith.constant 0 : index
    %c0_50 = arith.constant 0 : index
    %95 = vector.load %arg3[%c2_48, %c0_49, %c0_50] : memref<4x8x32xf32, #tpu.memory_space<vmem>>, vector<1x8x32xf32>
    %96 = vector.shape_cast %95 : vector<1x8x32xf32> to vector<8x32xf32>
    %cst_51 = arith.constant dense<0.000000e+00> : vector<16x32xf32>
    %97 = tpu.matmul %94, %96, %cst_51 {dimension_numbers = #tpu.dot_dimension_numbers<[1], [0], [0], [1], [0, 0, 1, 1], [], []>} : vector<16x8xf32>, vector<8x32xf32>, vector<16x32xf32> -> vector<16x32xf32>
    %98 = arith.addf %87, %97 : vector<16x32xf32>
    %99 = vector.extract_strided_slice %12 {offsets = [0, 88], sizes = [8, 8], strides = [1, 1]} : vector<16x96xf32> to vector<8x8xf32>
    %100 = vector.extract_strided_slice %65 {offsets = [24, 0], sizes = [8, 8], strides = [1, 1]} : vector<64x8xf32> to vector<8x8xf32>
    %cst_52 = arith.constant dense<0.000000e+00> : vector<8x8xf32>
    %101 = tpu.matmul %100, %99, %cst_52 {dimension_numbers = #tpu.dot_dimension_numbers<[1], [0], [0], [1], [0, 0, 1, 1], [], []>} : vector<8x8xf32>, vector<8x8xf32>, vector<8x8xf32> -> vector<8x8xf32>
    %102 = vector.extract_strided_slice %12 {offsets = [8, 88], sizes = [8, 8], strides = [1, 1]} : vector<16x96xf32> to vector<8x8xf32>
    %103 = vector.extract_strided_slice %65 {offsets = [56, 0], sizes = [8, 8], strides = [1, 1]} : vector<64x8xf32> to vector<8x8xf32>
    %cst_53 = arith.constant dense<0.000000e+00> : vector<8x8xf32>
    %104 = tpu.matmul %103, %102, %cst_53 {dimension_numbers = #tpu.dot_dimension_numbers<[1], [0], [0], [1], [0, 0, 1, 1], [], []>} : vector<8x8xf32>, vector<8x8xf32>, vector<8x8xf32> -> vector<8x8xf32>
    %105 = tpu.concatenate %101, %104 in 0 : vector<8x8xf32>, vector<8x8xf32> -> vector<16x8xf32>
    %c3_54 = arith.constant 3 : index
    %c0_55 = arith.constant 0 : index
    %c0_56 = arith.constant 0 : index
    %106 = vector.load %arg3[%c3_54, %c0_55, %c0_56] : memref<4x8x32xf32, #tpu.memory_space<vmem>>, vector<1x8x32xf32>
    %107 = vector.shape_cast %106 : vector<1x8x32xf32> to vector<8x32xf32>
    %cst_57 = arith.constant dense<0.000000e+00> : vector<16x32xf32>
    %108 = tpu.matmul %105, %107, %cst_57 {dimension_numbers = #tpu.dot_dimension_numbers<[1], [0], [0], [1], [0, 0, 1, 1], [], []>} : vector<16x8xf32>, vector<8x32xf32>, vector<16x32xf32> -> vector<16x32xf32>
    %109 = arith.addf %98, %108 : vector<16x32xf32>
    %110 = vector.broadcast %2 : vector<1x32xf32> to vector<16x32xf32>
    %111 = arith.addf %109, %110 : vector<16x32xf32>
    %112 = arith.addf %111, %0 : vector<16x32xf32>
    %cst_58 = arith.constant dense<0.000000e+00> : vector<16xf32>
    %113 = vector.multi_reduction <add>, %112, %cst_58 [1] : vector<16x32xf32> to vector<16xf32>
    %114 = vector.shape_cast %113 : vector<16xf32> to vector<16x1xf32>
    %cst_59 = arith.constant 3.200000e+01 : f32
    %115 = vector.broadcast %cst_59 : f32 to vector<16x1xf32>
    %116 = arith.divf %114, %115 : vector<16x1xf32>
    %117 = vector.broadcast %116 : vector<16x1xf32> to vector<16x32xf32>
    %118 = arith.subf %112, %117 : vector<16x32xf32>
    %119 = arith.mulf %118, %118 : vector<16x32xf32>
    %cst_60 = arith.constant dense<0.000000e+00> : vector<16xf32>
    %120 = vector.multi_reduction <add>, %119, %cst_60 [1] : vector<16x32xf32> to vector<16xf32>
    %121 = vector.shape_cast %120 : vector<16xf32> to vector<16x1xf32>
    %cst_61 = arith.constant 3.200000e+01 : f32
    %122 = vector.broadcast %cst_61 : f32 to vector<16x1xf32>
    %123 = arith.divf %121, %122 : vector<16x1xf32>
    %124 = vector.broadcast %116 : vector<16x1xf32> to vector<16x32xf32>
    %125 = arith.subf %112, %124 : vector<16x32xf32>
    %cst_62 = arith.constant 9.99999974E-6 : f32
    %126 = vector.broadcast %cst_62 : f32 to vector<16x1xf32>
    %127 = arith.addf %123, %126 : vector<16x1xf32>
    %128 = math.rsqrt %127 : vector<16x1xf32>
    %129 = vector.broadcast %128 : vector<16x1xf32> to vector<16x32xf32>
    %130 = arith.mulf %125, %129 : vector<16x32xf32>
    %131 = vector.broadcast %3 : vector<1x32xf32> to vector<16x32xf32>
    %132 = arith.mulf %130, %131 : vector<16x32xf32>
    %133 = vector.broadcast %4 : vector<1x32xf32> to vector<16x32xf32>
    %134 = arith.addf %132, %133 : vector<16x32xf32>
    %c0_63 = arith.constant 0 : index
    %c0_64 = arith.constant 0 : index
    %135 = vector.load %arg4[%c0_63, %c0_64] : memref<32x64xf32, #tpu.memory_space<vmem>>, vector<32x64xf32>
    %cst_65 = arith.constant dense<0.000000e+00> : vector<16x64xf32>
    %136 = tpu.matmul %134, %135, %cst_65 {dimension_numbers = #tpu.dot_dimension_numbers<[1], [0], [0], [1], [0, 0, 1, 1], [], []>} : vector<16x32xf32>, vector<32x64xf32>, vector<16x64xf32> -> vector<16x64xf32>
    %137 = vector.broadcast %5 : vector<1x64xf32> to vector<16x64xf32>
    %138 = arith.addf %136, %137 : vector<16x64xf32>
    %cst_66 = arith.constant 0.000000e+00 : f32
    %139 = vector.broadcast %cst_66 : f32 to vector<16x64xf32>
    %140 = arith.maximumf %138, %139 : vector<16x64xf32>
    %c0_67 = arith.constant 0 : index
    %c0_68 = arith.constant 0 : index
    %141 = vector.load %arg5[%c0_67, %c0_68] : memref<64x32xf32, #tpu.memory_space<vmem>>, vector<64x32xf32>
    %cst_69 = arith.constant dense<0.000000e+00> : vector<16x32xf32>
    %142 = tpu.matmul %140, %141, %cst_69 {dimension_numbers = #tpu.dot_dimension_numbers<[1], [0], [0], [1], [0, 0, 1, 1], [], []>} : vector<16x64xf32>, vector<64x32xf32>, vector<16x32xf32> -> vector<16x32xf32>
    %143 = vector.broadcast %6 : vector<1x32xf32> to vector<16x32xf32>
    %144 = arith.addf %142, %143 : vector<16x32xf32>
    %145 = arith.addf %144, %134 : vector<16x32xf32>
    %cst_70 = arith.constant dense<0.000000e+00> : vector<16xf32>
    %146 = vector.multi_reduction <add>, %145, %cst_70 [1] : vector<16x32xf32> to vector<16xf32>
    %147 = vector.shape_cast %146 : vector<16xf32> to vector<16x1xf32>
    %cst_71 = arith.constant 3.200000e+01 : f32
    %148 = vector.broadcast %cst_71 : f32 to vector<16x1xf32>
    %149 = arith.divf %147, %148 : vector<16x1xf32>
    %150 = vector.broadcast %149 : vector<16x1xf32> to vector<16x32xf32>
    %151 = arith.subf %145, %150 : vector<16x32xf32>
    %152 = arith.mulf %151, %151 : vector<16x32xf32>
    %cst_72 = arith.constant dense<0.000000e+00> : vector<16xf32>
    %153 = vector.multi_reduction <add>, %152, %cst_72 [1] : vector<16x32xf32> to vector<16xf32>
    %154 = vector.shape_cast %153 : vector<16xf32> to vector<16x1xf32>
    %cst_73 = arith.constant 3.200000e+01 : f32
    %155 = vector.broadcast %cst_73 : f32 to vector<16x1xf32>
    %156 = arith.divf %154, %155 : vector<16x1xf32>
    %157 = vector.broadcast %149 : vector<16x1xf32> to vector<16x32xf32>
    %158 = arith.subf %145, %157 : vector<16x32xf32>
    %cst_74 = arith.constant 9.99999974E-6 : f32
    %159 = vector.broadcast %cst_74 : f32 to vector<16x1xf32>
    %160 = arith.addf %156, %159 : vector<16x1xf32>
    %161 = math.rsqrt %160 : vector<16x1xf32>
    %162 = vector.broadcast %161 : vector<16x1xf32> to vector<16x32xf32>
    %163 = arith.mulf %158, %162 : vector<16x32xf32>
    %164 = vector.broadcast %7 : vector<1x32xf32> to vector<16x32xf32>
    %165 = arith.mulf %163, %164 : vector<16x32xf32>
    %166 = vector.broadcast %8 : vector<1x32xf32> to vector<16x32xf32>
    %167 = arith.addf %165, %166 : vector<16x32xf32>
    %c0_75 = arith.constant 0 : index
    %c0_76 = arith.constant 0 : index
    %168 = vector.load %arg7[%c0_75, %c0_76] : memref<16x32xf32, #tpu.memory_space<vmem>>, vector<16x32xf32>
    tpu.vector_store %arg7[%c0_75, %c0_76], %167 {strides = array<i32>} : memref<16x32xf32, #tpu.memory_space<vmem>>, vector<16x32xf32>,
    return
  }
}

</mosaic_0001>

<bundles_post_ra>
// kernel: encoder_layer.1
= control target key start
LH: loop header
LB: loop body
LE: loop exit
PB: predicated region body
PF: predicated region fallthrough
CT: control target
= control target key end

     0   :  { %14 = vsyncpa [#allocation3], 0  ;;  %vm48_vm0 = vcmask 261120   ;;  %s2908_s0 = inlined_call_operand.vmem [shape: f32[16,32], index: 0, kind: input, shape index: {}]   ;;  %s2909_s1 = inlined_call_operand.vmem [shape: f32[64,8], index: 1, kind: input, shape index: {}]   ;;  %s2910_s2 = inlined_call_operand.vmem [shape: f32[32,96], index: 2, kind: input, shape index: {}]   ;;  %s2911_s3 = inlined_call_operand.vmem [shape: f32[4,8,32], index: 3, kind: input, shape index: {}]   ;;  %s2912_s4 = inlined_call_operand.vmem [shape: f32[32,64], index: 4, kind: input, shape index: {}]   ;;  %s2913_s5 = inlined_call_operand.vmem [shape: f32[64,32], index: 5, kind: input, shape index: {}]   ;;  %s2914_s6 = inlined_call_operand.vmem [shape: f32[8,128], index: 6, kind: input, shape index: {}]   ;;  %s2915_s7 = inlined_call_operand.hbm [shape: f32[16,32], index: 7, kind: output, shape index: {0}]   ;;  %s2916_s8 = inlined_call_operand.hbm [shape: f32[64,8], index: 8, kind: output, shape index: {1}]  }
   0x1   :  { %v40_v0 = vld [vmem:[%s2910_s2] sm:$0xff]  ;;  %v41_v1 = vld [vmem:[%s2910_s2 + $0x8] sm:$0xff]  ;;  %v42_v2 = vld [vmem:[%s2910_s2 + $0x10] sm:$0xff] }
   0x2   :  { %v2378_v3 = vpack.c.bf16 %v41_v1, %v40_v0  ;;  %v43_v4 = vld [vmem:[%s2910_s2 + $0x18] sm:$0xff]  ;;  %v2598_v5 = vld [vmem:[%s2908_s0] sm:$0xff] }
   0x3   :  { %v2382_v6 = vpack.c.bf16 %v43_v4, %v42_v2  ;;  %2245 = vmatprep.mubr.msk.f32.mxu1 %vm48_vm0, %v2598_v5 }
   0x4   :  { %15 = vsyncpa [#allocation5], 0  ;;  %2379 = vmatprep.subr.bf16.mxu1 %v2378_v3  ;;  %v2605_v7 = vld [vmem:[%s2908_s0 + $0x8] sm:$0xff]  ;;  %v2521_v8 = vmov 0.0   ;;  %vm2522_vm1 = vmmov 0   ;;  %s2523_s0 = smov 80  }
   0x5   :  { %2381 = vmatpush3.bf16.msra.mxu1 %v2378_v3  ;;  %2258 = vmatprep.subr.mxu0 %v2521_v8  ;;  %v2122_v9 = vld [vmem:[%s2914_s6] ss:$0 sm:$0xff]  ;;  %s2524_s18 = smov 96   ;;  %s2525_s19 = smov 120   ;;  %vm133_vm2 = vcmask 64512   ;;  %v762_v34 = vld [vmem:[%s2909_s1 + $0x8] sm:$0xff] }
   0x6   :  { %2383 = vmatprep.subr.bf16.mxu1 %v2382_v6  ;;  %2260 = vmatprep.mubr.msk.f32.mxu0 %vm2522_vm1, %v2521_v8  ;;  %s2526_s20 = smov 88   ;;  %s2527_s21 = smov 72   ;;  %v761_v29 = vld [vmem:[%s2909_s1] sm:$0xff]  ;;  %v763_v49 = vld [vmem:[%s2909_s1 + $0x10] sm:$0xff]  ;;  %v766_v52 = vld [vmem:[%s2909_s1 + $0x28] sm:$0xff]  ;;  %vm1966_vm3 = vcmask 523264  }
   0x7   :  { %s2528_s22 = smov 112   ;;  %s2529_s23 = smov 104   ;;  %v765_v45 = vld [vmem:[%s2909_s1 + $0x20] sm:$0xff]  ;;  %v767_v59 = vld [vmem:[%s2909_s1 + $0x30] sm:$0xff] }
   0x8   :  { %s2530_s14 = smov 64   ;;  %s2531_s15 = smov 56  }
   0x9   :  { %2385 = vmatpush3.bf16.msra.mxu1 %v2382_v6  ;;  %s2532_s16 = smov 48  }
   0xa   :  { %2248 = vmatprep.subr.mxu1 %v2521_v8 }
   0xc   :  { %2246 = vmatmul.mubr.msk.f32.vlgmr.msra.gmra.mrb[0].mxu1 %vm48_vm0, %v2605_v7 }
   0xd   :  { %2250 = vmatprep.mubr.msk.f32.mxu1 %vm2522_vm1, %v2521_v8 }
  0xdf   :  { %v2247_v10 = vpop.f32.mrb[0].mxu1 }
  0xe0   :  { %v121_v11 = vpop.f32.mrb[1].mxu1  ;;  %v2626_v13 = vadd.f32 %v2247_v10, %v2122_v9 }
  0xe1   :  { %v2618_v12 = vadd.f32 %v2122_v9, %v121_v11 }
  0xe3   :  { %290 = vrot.lane.b32.xlu1 %v2618_v12, %s2523_s0  ;;  %131 = vrot.lane.b32.xlu0 %v2618_v12, %s2524_s18 }
  0xe7   :  { %209 = vrot.lane.b32.xlu1 %v2618_v12, %s2525_s19  ;;  %211 = vrot.lane.b32.xlu0 %v2618_v12, %s2526_s20 }
  0xeb   :  { %369 = vrot.lane.b32.xlu1 %v2618_v12, %s2527_s21  ;;  %288 = vrot.lane.b32.xlu0 %v2618_v12, %s2528_s22 }
  0xef   :  { %367 = vrot.lane.b32.xlu1 %v2618_v12, %s2529_s23  ;;  %447 = vrot.lane.b32.xlu0 %v2626_v13, %s2524_s18 }
  0xf3   :  { %524 = vrot.lane.b32.xlu1 %v2626_v13, %s2525_s19  ;;  %526 = vrot.lane.b32.xlu0 %v2626_v13, %s2526_s20  ;;  %s2533_s19 = smov 40  }
  0xf7   :  { %603 = vrot.lane.b32.xlu1 %v2626_v13, %s2528_s22  ;;  %605 = vrot.lane.b32.xlu0 %v2626_v13, %s2523_s0 }
  0xfb   :  { %682 = vrot.lane.b32.xlu1 %v2626_v13, %s2529_s23  ;;  %684 = vrot.lane.b32.xlu0 %v2626_v13, %s2527_s21 }
 0x155   :  { %v291_v14 = vpop.permute.xlu1 %290  ;;  %v132_v15 = vpop.permute.xlu0 %131 }
 0x156   :  { %2249 = vmatpush3.xpose.msk.msra.mxu1 %vm133_vm2, %v132_v15  ;;  %2259 = vmatpush3.xpose.msk.msra.mxu0 %vm133_vm2, %v291_v14 }
 0x157   :  { %2253 = vmatprep.subr.mxu1 %v2521_v8  ;;  %2268 = vmatprep.subr.mxu0 %v2521_v8 }
 0x159   :  { %v210_v16 = vpop.permute.xlu1 %209  ;;  %2251 = vmatmul.mubr.msk.f32.vlgmr.msra.gmra.mrb[2].mxu1 %vm133_vm2, %v2618_v12  ;;  %v212_v17 = vpop.permute.xlu0 %211 }
 0x15a   :  { %2254 = vmatpush3.xpose.msk.msra.mxu1 %vm133_vm2, %v212_v17  ;;  %2255 = vmatprep.mubr.msk.f32.mxu1 %vm2522_vm1, %v2521_v8 }
 0x15b   :  { %2263 = vmatprep.subr.mxu1 %v2521_v8 }
 0x15d   :  { %v370_v18 = vpop.permute.xlu1 %369  ;;  %2256 = vmatmul.mubr.msk.f32.vlgmr.msra.gmra.mrb[4].mxu1 %vm133_vm2, %v210_v16  ;;  %v289_v19 = vpop.permute.xlu0 %288 }
 0x15e   :  { %2261 = vmatmul.mubr.msk.f32.vlgmr.msra.gmra.mrb[0].mxu0 %vm133_vm2, %v289_v19  ;;  %2264 = vmatpush3.xpose.msk.msra.mxu1 %vm133_vm2, %v370_v18 }
 0x15f   :  { %2265 = vmatprep.mubr.msk.f32.mxu1 %vm2522_vm1, %v2521_v8  ;;  %2270 = vmatprep.mubr.msk.f32.mxu0 %vm2522_vm1, %v2521_v8 }
 0x160   :  { %2273 = vmatprep.subr.mxu1 %v2521_v8 }
 0x161   :  { %v368_v20 = vpop.permute.xlu1 %367  ;;  %v448_v21 = vpop.permute.xlu0 %447 }
 0x162   :  { %2266 = vmatmul.mubr.msk.f32.vlgmr.msra.gmra.mrb[6].mxu1 %vm133_vm2, %v368_v20  ;;  %2269 = vmatpush3.xpose.msk.msra.mxu0 %vm133_vm2, %v448_v21 }
 0x163   :  { %2275 = vmatprep.mubr.msk.f32.mxu1 %vm2522_vm1, %v2521_v8  ;;  %2278 = vmatprep.subr.mxu0 %v2521_v8 }
 0x165   :  { %v525_v22 = vpop.permute.xlu1 %524  ;;  %2271 = vmatmul.mubr.msk.f32.vlgmr.msra.gmra.mrb[2].mxu0 %vm133_vm2, %v2626_v13  ;;  %v527_v23 = vpop.permute.xlu0 %526 }
 0x166   :  { %2274 = vmatpush3.xpose.msk.msra.mxu1 %vm133_vm2, %v527_v23  ;;  %2280 = vmatprep.mubr.msk.f32.mxu0 %vm2522_vm1, %v2521_v8 }
 0x167   :  { %2283 = vmatprep.subr.mxu1 %v2521_v8 }
 0x169   :  { %2276 = vmatmul.mubr.msk.f32.vlgmr.msra.gmra.mrb[8].mxu1 %vm133_vm2, %v525_v22  ;;  %v606_v24 = vpop.permute.xlu0 %605  ;;  %v604_v25 = vpop.permute.xlu1 %603 }
 0x16a   :  { %2279 = vmatpush3.xpose.msk.msra.mxu0 %vm133_vm2, %v606_v24  ;;  %2285 = vmatprep.mubr.msk.f32.mxu1 %vm2522_vm1, %v2521_v8 }
 0x16b   :  { %2288 = vmatprep.subr.mxu0 %v2521_v8 }
 0x16d   :  { %2281 = vmatmul.mubr.msk.f32.vlgmr.msra.gmra.mrb[4].mxu0 %vm133_vm2, %v604_v25  ;;  %v685_v26 = vpop.permute.xlu0 %684  ;;  %v683_v27 = vpop.permute.xlu1 %682 }
 0x16e   :  { %2284 = vmatpush3.xpose.msk.msra.mxu1 %vm133_vm2, %v685_v26  ;;  %2290 = vmatprep.mubr.msk.f32.mxu0 %vm2522_vm1, %v2521_v8 }
 0x16f   :  { %2293 = vmatprep.subr.mxu1 %v2521_v8 }
 0x171   :  { %2286 = vmatmul.mubr.msk.f32.vlgmr.msra.gmra.mrb[10].mxu1 %vm133_vm2, %v683_v27 }
 0x172   :  { %2295 = vmatprep.mubr.msk.f32.mxu1 %vm2522_vm1, %v2521_v8 }
 0x22c   :  { %v204_v28 = vpop.f32.mrb[2].mxu1 }
 0x22d   :  { %v208_v30 = vmul.f32 0.35355338, %v204_v28  ;;  %v2252_v31 = vpop.f32.mrb[3].mxu1 }
 0x22f   :  { %v769_v32 = vadd.f32 %v761_v29, %v208_v30 }
 0x230   :  { %v283_v33 = vpop.f32.mrb[4].mxu1 }
 0x231   :  { %v287_v35 = vmul.f32 0.35355338, %v283_v33  ;;  %v2257_v36 = vpop.f32.mrb[5].mxu1  ;;  %v362_v37 = vpop.f32.mrb[0].mxu0  ;;  %v777_v38 = vsel %vm133_vm2, %v769_v32, -inf }
 0x232   :  { %778 = vmax.xlane.f32.xlu0 %v777_v38  ;;  %v2262_v39 = vpop.f32.mrb[1].mxu0  ;;  %v366_v46 = vmul.f32 0.35355338, %v362_v37 }
 0x233   :  { %v770_v40 = vadd.f32 %v762_v34, %v287_v35 }
 0x234   :  { %v771_v56 = vadd.f32 %v763_v49, %v366_v46 }
 0x235   :  { %v2685_v41 = vpop.f32.mrb[6].mxu1  ;;  %v780_v42 = vsel %vm133_vm2, %v770_v40, -inf }
 0x236   :  { %781 = vmax.xlane.f32.xlu0 %v780_v42  ;;  %v2267_v43 = vpop.f32.mrb[7].mxu1  ;;  %v783_v62 = vsel %vm133_vm2, %v771_v56, -inf }
 0x237   :  { %v768_v43 = vld [vmem:[%s2909_s1 + $0x38] sm:$0xff] }
 0x238   :  { %v519_v44 = vpop.f32.mrb[2].mxu0 }
 0x239   :  { %v523_v47 = vmul.f32 0.35355338, %v519_v44  ;;  %v2272_v48 = vpop.f32.mrb[3].mxu0  ;;  %v764_v44 = vld [vmem:[%s2909_s1 + $0x18] sm:$0xff] }
 0x23b   :  { %v773_v50 = vadd.f32 %v765_v45, %v523_v47 }
 0x23c   :  { %v598_v51 = vpop.f32.mrb[8].mxu1 }
 0x23d   :  { %v602_v53 = vmul.f32 0.35355338, %v598_v51  ;;  %v2277_v54 = vpop.f32.mrb[9].mxu1  ;;  %v789_v55 = vsel %vm133_vm2, %v773_v50, -inf }
 0x23e   :  { %790 = vmax.xlane.f32.xlu1 %v789_v55 }
 0x23f   :  { %v774_v57 = vadd.f32 %v766_v52, %v602_v53 }
 0x240   :  { %v677_v58 = vpop.f32.mrb[4].mxu0 }
 0x241   :  { %v681_v60 = vmul.f32 0.35355338, %v677_v58  ;;  %v2282_v61 = vpop.f32.mrb[5].mxu0  ;;  %v792_v63 = vsel %vm133_vm2, %v774_v57, -inf }
 0x242   :  { %784 = vmax.xlane.f32.xlu1 %v783_v62  ;;  %793 = vmax.xlane.f32.xlu0 %v792_v63 }
 0x243   :  { %v775_v0 = vadd.f32 %v767_v59, %v681_v60 }
 0x244   :  { %v756_v1 = vpop.f32.mrb[10].mxu1 }
 0x245   :  { %v2287_v2 = vpop.f32.mrb[11].mxu1  ;;  %v795_v3 = vsel %vm133_vm2, %v775_v0, -inf  ;;  %v760_v42 = vmul.f32 0.35355338, %v756_v1 }
 0x246   :  { %796 = vmax.xlane.f32.xlu0 %v795_v3 }
 0x247   :  { %v2735_v45 = vadd.f32 %v768_v43, %v760_v42 }
 0x249   :  { %v798_v47 = vsel %vm133_vm2, %v2735_v45, -inf }
 0x253   :  { %873 = vrot.lane.b32.xlu1 %v2618_v12, %s2530_s14 }
 0x2bf   :  { %v779_v4 = vpop.xlane.xlu0 %778 }
 0x2c0   :  { %v801_v6 = vsub.f32 %v769_v32, %v779_v4 }
 0x2c2   :  { %v809_v9 = vmul.f32 1.442695, %v801_v6 }
 0x2c3   :  { %v782_v10 = vpop.xlane.xlu0 %781 }
 0x2c4   :  { %2433 = vpow2.f32 %v809_v9  ;;  %v802_v16 = vsub.f32 %v770_v40, %v782_v10  ;;  %v445_v40 = vmul.f32 0.35355338, %v2685_v41 }
 0x2c6   :  { %v811_v22 = vmul.f32 1.442695, %v802_v16  ;;  %v2737_v46 = vadd.f32 %v764_v44, %v445_v40  ;;  %v2157_v44 = vld [vmem:[%s2911_s3 + $0x18] sm:$0xff] }
 0x2c8   :  { %v786_v48 = vsel %vm133_vm2, %v2737_v46, -inf }
 0x2cb   :  { %v791_v11 = vpop.xlane.xlu1 %790 }
 0x2cc   :  { %v805_v14 = vsub.f32 %v773_v50, %v791_v11 }
 0x2ce   :  { %v2434_v15 = vpop.eup %2433  ;;  %v817_v17 = vmul.f32 1.442695, %v805_v14 }
 0x2cf   :  { %v785_v18 = vpop.xlane.xlu1 %784  ;;  %v794_v19 = vpop.xlane.xlu0 %793  ;;  %v825_v20 = vsel %vm133_vm2, %v2434_v15, 0.0 }
 0x2d0   :  { %2435 = vpow2.f32 %v817_v17  ;;  %v803_v21 = vsub.f32 %v771_v56, %v785_v18  ;;  %826 = vadd.xlane.f32.xlu1 %v825_v20  ;;  %v806_v24 = vsub.f32 %v774_v57, %v794_v19 }
 0x2d2   :  { %v813_v23 = vmul.f32 1.442695, %v803_v21  ;;  %v819_v28 = vmul.f32 1.442695, %v806_v24 }
 0x2d3   :  { %v874_v25 = vpop.permute.xlu1 %873  ;;  %v797_v26 = vpop.xlane.xlu0 %796 }
 0x2d4   :  { %2437 = vpow2.f32 %v813_v23  ;;  %v807_v27 = vsub.f32 %v775_v0, %v797_v26  ;;  %2289 = vmatpush3.msra.mxu0 %v874_v25  ;;  %v1025_v23 = vld [vmem:[%s2911_s3] sm:$0xff] }
 0x2d5   :  { %2298 = vmatprep.subr.mxu0 %v2521_v8  ;;  %2439 = vpow2.f32 %v811_v22  ;;  %v2145_v22 = vld [vmem:[%s2911_s3 + $0x8] sm:$0xff] }
 0x2d6   :  { %v821_v29 = vmul.f32 1.442695, %v807_v27 }
 0x2d8   :  { %2441 = vpow2.f32 %v821_v29 }
 0x2d9   :  { %2443 = vpow2.f32 %v819_v28 }
 0x2da   :  { %v2436_v30 = vpop.eup %2435 }
 0x2db   :  { %v837_v31 = vsel %vm133_vm2, %v2436_v30, 0.0 }
 0x2dc   :  { %838 = vadd.xlane.f32.xlu0 %v837_v31 }
 0x2de   :  { %v2438_v32 = vpop.eup %2437 }
 0x2df   :  { %v831_v33 = vsel %vm133_vm2, %v2438_v32, 0.0  ;;  %v2710_v34 = vpop.eup %2439 }
 0x2e0   :  { %832 = vadd.xlane.f32.xlu1 %v831_v33  ;;  %v828_v36 = vsel %vm133_vm2, %v2710_v34, 0.0 }
 0x2e2   :  { %v2712_v35 = vpop.eup %2441 }
 0x2e3   :  { %v843_v37 = vsel %vm133_vm2, %v2712_v35, 0.0  ;;  %v2718_v38 = vpop.eup %2443 }
 0x2e4   :  { %829 = vadd.xlane.f32.xlu1 %v828_v36  ;;  %844 = vadd.xlane.f32.xlu0 %v843_v37  ;;  %v840_v39 = vsel %vm133_vm2, %v2718_v38, 0.0 }
 0x2e8   :  { %841 = vadd.xlane.f32.xlu0 %v840_v39 }
 0x2f5   :  { %1026 = vrot.lane.b32.xlu1 %v2618_v12, %s2531_s15 }
 0x2f9   :  { %1102 = vrot.lane.b32.xlu1 %v2626_v13, %s2531_s15 }
 0x2fd   :  { %1418 = vrot.lane.b32.xlu1 %v2626_v13, %s2532_s16 }
 0x2fe   :  { %949 = vrot.lane.b32.xlu0 %v2626_v13, %s2530_s14 }
 0x302   :  { %1342 = vrot.lane.b32.xlu0 %v2618_v12, %s2532_s16 }
 0x321   :  { %799 = vmax.xlane.f32.xlu1 %v798_v47  ;;  %787 = vmax.xlane.f32.xlu0 %v786_v48 }
 0x332   :  { %1579 = vrot.lane.b32.xlu1 %v2618_v12, %s2533_s19 }
 0x35d   :  { %v827_v41 = vpop.xlane.xlu1 %826 }
 0x35e   :  { %2445 = vrcp.f32 %v827_v41 }
 0x368   :  { %v2446_v49 = vpop.eup %2445 }
 0x369   :  { %v857_v50 = vmul.f32 %v2446_v49, %v2434_v15  ;;  %v839_v51 = vpop.xlane.xlu0 %838 }
 0x36a   :  { %2447 = vrcp.f32 %v839_v51 }
 0x36b   :  { %865 = vst.msk [vmem:[#allocation4] sm:$0xff] %vm133_vm2, %v857_v50  ;;  %2291 = vmatmul.mubr.msk.f32.vlgmr.msra.gmra.mrb[6].mxu0 %vm133_vm2, %v857_v50 }
 0x36c   :  { %2300 = vmatprep.mubr.msk.f32.mxu0 %vm2522_vm1, %v2521_v8 }
 0x36d   :  { %v833_v52 = vpop.xlane.xlu1 %832 }
 0x36e   :  { %2449 = vrcp.f32 %v833_v52 }
 0x371   :  { %v830_v53 = vpop.xlane.xlu1 %829  ;;  %v845_v54 = vpop.xlane.xlu0 %844 }
 0x372   :  { %2451 = vrcp.f32 %v830_v53 }
 0x373   :  { %2453 = vrcp.f32 %v845_v54 }
 0x374   :  { %v2448_v12 = vpop.eup %2447 }
 0x375   :  { %v861_v55 = vmul.f32 %v2448_v12, %v2436_v30  ;;  %v1027_v56 = vpop.permute.xlu1 %1026  ;;  %v842_v57 = vpop.xlane.xlu0 %841 }
 0x376   :  { %2455 = vrcp.f32 %v842_v57  ;;  %2299 = vmatpush3.msra.mxu0 %v1027_v56 }
 0x377   :  { %869 = vst.msk [vmem:[#allocation4 + $0x20] sm:$0xff] %vm133_vm2, %v861_v55  ;;  %2308 = vmatprep.subr.mxu0 %v2145_v22 }
 0x378   :  { %v2450_v58 = vpop.eup %2449 }
 0x379   :  { %v859_v59 = vmul.f32 %v2450_v58, %v2438_v32  ;;  %v950_v60 = vpop.permute.xlu0 %949  ;;  %v1103_v61 = vpop.permute.xlu1 %1102 }
 0x37a   :  { %2294 = vmatpush3.msra.mxu1 %v950_v60 }
 0x37b   :  { %867 = vst.msk [vmem:[#allocation4 + $0x10] sm:$0xff] %vm133_vm2, %v859_v59  ;;  %2296 = vmatmul.mubr.msk.f32.vlgmr.msra.gmra.mrb[12].mxu1 %vm133_vm2, %v861_v55  ;;  %2303 = vmatprep.subr.mxu1 %v2521_v8 }
 0x37c   :  { %v2452_v62 = vpop.eup %2451  ;;  %2304 = vmatpush3.msra.mxu1 %v1103_v61  ;;  %2305 = vmatprep.mubr.msk.f32.mxu1 %vm2522_vm1, %v2521_v8 }
 0x37d   :  { %v2454_v63 = vpop.eup %2453  ;;  %v858_v0 = vmul.f32 %v2452_v62, %v2710_v34  ;;  %2318 = vmatprep.subr.mxu1 %v2521_v8  ;;  %v1343_v4 = vpop.permute.xlu0 %1342 }
 0x37e   :  { %v863_v1 = vmul.f32 %v2454_v63, %v2712_v35  ;;  %v1419_v6 = vpop.permute.xlu1 %1418 }
 0x37f   :  { %866 = vst.msk [vmem:[#allocation4 + $0x8] sm:$0xff] %vm133_vm2, %v858_v0  ;;  %2301 = vmatmul.mubr.msk.f32.vlgmr.msra.gmra.mrb[8].mxu0 %vm133_vm2, %v858_v0  ;;  %v1864_v0 = vld [vmem:[%s2912_s4 + $0x8] sm:$0xff] }
 0x380   :  { %v2456_v2 = vpop.eup %2455  ;;  %871 = vst.msk [vmem:[#allocation4 + $0x30] sm:$0xff] %vm133_vm2, %v863_v1  ;;  %2309 = vmatpush3.msra.mxu0 %v2145_v22 }
 0x381   :  { %v862_v3 = vmul.f32 %v2456_v2, %v2718_v38  ;;  %2313 = vmatprep.subr.mxu0 %v1025_v23  ;;  %v1865_v2 = vld [vmem:[%s2912_s4 + $0x10] sm:$0xff] }
 0x383   :  { %870 = vst.msk [vmem:[#allocation4 + $0x28] sm:$0xff] %vm133_vm2, %v862_v3  ;;  %2306 = vmatmul.mubr.msk.f32.vlgmr.msra.gmra.mrb[14].mxu1 %vm133_vm2, %v862_v3  ;;  %v1866_v3 = vld [vmem:[%s2912_s4 + $0x18] sm:$0xff] }
 0x384   :  { %2319 = vmatpush3.msra.mxu1 %v1343_v4  ;;  %2320 = vmatprep.mubr.msk.f32.mxu1 %vm2522_vm1, %v2521_v8  ;;  %v2390_v4 = vpack.c.bf16 %v1866_v3, %v1865_v2 }
 0x385   :  { %2323 = vmatprep.subr.mxu1 %v2521_v8 }
 0x387   :  { %2321 = vmatmul.mubr.msk.f32.vlgmr.msra.gmra.mrb[16].mxu1 %vm133_vm2, %v859_v59 }
 0x388   :  { %2324 = vmatpush3.msra.mxu1 %v1419_v6  ;;  %2325 = vmatprep.mubr.msk.f32.mxu1 %vm2522_vm1, %v2521_v8  ;;  %v1954_v6 = vld [vmem:[%s2913_s5] sm:$0xff] }
 0x389   :  { %2333 = vmatprep.subr.mxu1 %v2521_v8 }
 0x38b   :  { %2326 = vmatmul.mubr.msk.f32.vlgmr.msra.gmra.mrb[18].mxu1 %vm133_vm2, %v863_v1 }
 0x38c   :  { %2335 = vmatprep.mubr.msk.f32.mxu1 %vm2522_vm1, %v2521_v8 }
 0x3ae   :  { %v800_v9 = vpop.xlane.xlu1 %799  ;;  %v788_v10 = vpop.xlane.xlu0 %787 }
 0x3af   :  { %v808_v11 = vsub.f32 %v2735_v45, %v800_v9  ;;  %v804_v14 = vsub.f32 %v2737_v46, %v788_v10  ;;  %v1955_v9 = vld [vmem:[%s2913_s5 + $0x8] sm:$0xff]  ;;  %v1956_v10 = vld [vmem:[%s2913_s5 + $0x10] sm:$0xff] }
 0x3b1   :  { %v815_v15 = vmul.f32 1.442695, %v804_v14  ;;  %v823_v16 = vmul.f32 1.442695, %v808_v11  ;;  %v2394_v11 = vpack.c.bf16 %v1955_v9, %v1954_v6  ;;  %v1957_v14 = vld [vmem:[%s2913_s5 + $0x18] sm:$0xff] }
 0x3b2   :  { %v1580_v17 = vpop.permute.xlu1 %1579 }
 0x3b3   :  { %2334 = vmatpush3.msra.mxu1 %v1580_v17  ;;  %2457 = vpow2.f32 %v815_v15  ;;  %v2398_v15 = vpack.c.bf16 %v1957_v14, %v1956_v10  ;;  %v1959_v17 = vld [vmem:[%s2913_s5 + $0x28] sm:$0xff] }
 0x3b4   :  { %2459 = vpow2.f32 %v823_v16  ;;  %v1958_v16 = vld [vmem:[%s2913_s5 + $0x20] sm:$0xff] }
 0x3bd   :  { %v2458_v18 = vpop.eup %2457 }
 0x3be   :  { %v834_v19 = vsel %vm133_vm2, %v2458_v18, 0.0  ;;  %v2460_v20 = vpop.eup %2459 }
 0x3bf   :  { %835 = vadd.xlane.f32.xlu0 %v834_v19  ;;  %v846_v21 = vsel %vm133_vm2, %v2460_v20, 0.0 }
 0x3c3   :  { %847 = vadd.xlane.f32.xlu0 %v846_v21 }
 0x3d9   :  { %1655 = vrot.lane.b32.xlu0 %v2626_v13, %s2533_s19  ;;  %v2152_v13 = vld [vmem:[%s2911_s3 + $0x10] sm:$0xff] }
 0x43e   :  { %v945_v24 = vpop.f32.mrb[6].mxu0 }
 0x43f   :  { %v2292_v25 = vpop.f32.mrb[7].mxu0 }
 0x44c   :  { %v836_v26 = vpop.xlane.xlu0 %835 }
 0x44d   :  { %2461 = vrcp.f32 %v836_v26  ;;  %v2161_v26 = vld [vmem:[%s2914_s6 + $0x2] ss:$0 sm:$0xff] }
 0x44e   :  { %v1021_v27 = vpop.f32.mrb[12].mxu1 }
 0x44f   :  { %v2297_v28 = vpop.f32.mrb[13].mxu1 }
 0x450   :  { %v848_v29 = vpop.xlane.xlu0 %847 }
 0x451   :  { %2463 = vrcp.f32 %v848_v29 }
 0x452   :  { %v1098_v30 = vpop.f32.mrb[8].mxu0 }
 0x453   :  { %v2302_v31 = vpop.f32.mrb[9].mxu0  ;;  %2310 = vmatprep.mubr.msk.f32.mxu0 %vm133_vm2, %v1098_v30  ;;  %v2162_v30 = vld [vmem:[%s2914_s6 + $0x3] ss:$0 sm:$0xff] }
 0x454   :  { %v1656_v43 = vpop.permute.xlu0 %1655 }
 0x456   :  { %v1174_v32 = vpop.f32.mrb[14].mxu1 }
 0x457   :  { %v2307_v33 = vpop.f32.mrb[15].mxu1  ;;  %2311 = vmatmul.mubr.msk.f32.vlgmr.msra.gmra.mrb[10].mxu0 %vm133_vm2, %v1174_v32  ;;  %v2462_v34 = vpop.eup %2461 }
 0x458   :  { %2314 = vmatpush3.msra.mxu0 %v1025_v23  ;;  %2315 = vmatprep.mubr.msk.f32.mxu0 %vm133_vm2, %v945_v24  ;;  %v860_v35 = vmul.f32 %v2462_v34, %v2458_v18  ;;  %v2402_v18 = vpack.c.bf16 %v1959_v17, %v1958_v16  ;;  %v1960_v34 = vld [vmem:[%s2913_s5 + $0x30] sm:$0xff] }
 0x459   :  { %2328 = vmatprep.subr.mxu0 %v2152_v13 }
 0x45a   :  { %v1414_v36 = vpop.f32.mrb[16].mxu1  ;;  %868 = vst.msk [vmem:[#allocation4 + $0x18] sm:$0xff] %vm133_vm2, %v860_v35  ;;  %2336 = vmatmul.mubr.msk.f32.vlgmr.msra.gmra.mrb[20].mxu1 %vm133_vm2, %v860_v35  ;;  %v1961_v35 = vld [vmem:[%s2913_s5 + $0x38] sm:$0xff]  ;;  %s2534_s5 = smov [#allocation4]  }
 0x45b   :  { %v2322_v37 = vpop.f32.mrb[17].mxu1  ;;  %v2464_v38 = vpop.eup %2463  ;;  %s2107_s11 = sshll.u32 %s2534_s5, 4  ;;  %s2108_s11 = int_to_ptr.vmem [resolvable:$true] %s2107_s11 }
 0x45c   :  { %v864_v39 = vmul.f32 %v2464_v38, %v2460_v20  ;;  %v2163_v37 = vld [vmem:[%s2914_s6 + $0x4] ss:$0 sm:$0xff]  ;;  %s2473_s12 = scalar_lea.vmem %s2108_s11, 1024  ;;  %p2478_p1 = scmp.lt.s32.totalorder %s2108_s11, %s2108_s11 }
 0x45d   :  { %p2474_p0 = scmp.ne.s32.totalorder %s2108_s11, %s2473_s12  ;;  %p2479_p2 = scmp.lt.s32.totalorder %s2473_s12, %s2473_s12 }
 0x45e   :  { %v1490_v40 = vpop.f32.mrb[18].mxu1  ;;  %872 = vst.msk [vmem:[#allocation4 + $0x38] sm:$0xff] %vm133_vm2, %v864_v39 }
 0x45f   :  { %2316 = vmatmul.mubr.msk.f32.vlgmr.msra.gmra.mrb[10].mxu0 %vm133_vm2, %v1021_v27  ;;  %v2327_v42 = vpop.f32.mrb[19].mxu1  ;;  %p2480_p3 = por %p2479_p2, %p2478_p1 }
 0x460   :  { %2329 = vmatpush3.msra.mxu0 %v2152_v13  ;;  %2330 = vmatprep.mubr.msk.f32.mxu0 %vm133_vm2, %v1414_v36  ;;  %v2406_v36 = vpack.c.bf16 %v1961_v35, %v1960_v34 }
 0x461   :  { %2338 = vmatprep.subr.mxu0 %v2521_v8  ;;  %p2481_p4 = pnand %p2480_p3, %p2474_p0 }
 0x467   :  { %2331 = vmatmul.mubr.msk.f32.vlgmr.msra.gmra.mrb[10].mxu0 %vm133_vm2, %v1490_v40 }
 0x468   :  { %2339 = vmatpush3.msra.mxu0 %v1656_v43  ;;  %2340 = vmatprep.mubr.msk.f32.mxu0 %vm2522_vm1, %v2521_v8  ;;  %v2160_v8 = vld [vmem:[%s2914_s6 + $0x1] ss:$0 sm:$0xff] }
 0x469   :  { %2343 = vmatprep.subr.mxu0 %v2157_v44 }
 0x46b   :  { %2341 = vmatmul.mubr.msk.f32.vlgmr.msra.gmra.mrb[12].mxu0 %vm133_vm2, %v864_v39 }
 0x46c   :  { %2344 = vmatpush3.msra.mxu0 %v2157_v44 }
 0x46d   :  { %2395 = vmatprep.subr.bf16.mxu0 %v2394_v11 }
 0x52d   :  { %v1651_v45 = vpop.f32.mrb[20].mxu1 }
 0x52e   :  { %v2337_v46 = vpop.f32.mrb[21].mxu1  ;;  %2345 = vmatprep.mubr.msk.f32.mxu0 %vm133_vm2, %v1651_v45  ;;  %v2166_v45 = vld [vmem:[%s2914_s6 + $0x5] ss:$0 sm:$0xff] }
 0x53e   :  { %v1727_v47 = vpop.f32.mrb[12].mxu0 }
 0x53f   :  { %v2342_v48 = vpop.f32.mrb[13].mxu0  ;;  %2346 = vmatmul.mubr.msk.f32.vlgmr.msra.gmra.mrb[10].mxu0 %vm133_vm2, %v1727_v47 }
 0x540   :  { %2397 = vmatpush3.bf16.msra.mxu0 %v2394_v11 }
 0x541   :  { %2399 = vmatprep.subr.bf16.mxu0 %v2398_v15 }
 0x544   :  { %2401 = vmatpush3.bf16.msra.mxu0 %v2398_v15 }
 0x545   :  { %2403 = vmatprep.subr.bf16.mxu0 %v2402_v18 }
 0x548   :  { %2405 = vmatpush3.bf16.msra.mxu0 %v2402_v18 }
 0x549   :  { %2407 = vmatprep.subr.bf16.mxu0 %v2406_v36 }
 0x54c   :  { %2409 = vmatpush3.bf16.msra.mxu0 %v2406_v36 }
 0x612   :  { %v2347_v41 = vpop.f32.mrb[10].mxu0 }
 0x613   :  { %v1821_v49 = vadd.f32 %v2347_v41, %v2160_v8  ;;  %v1805_v50 = vpop.f32.mrb[11].mxu0 }
 0x614   :  { %v1820_v51 = vadd.f32 %v2160_v8, %v1805_v50 }
 0x615   :  { %v1823_v52 = vadd.f32 %v1821_v49, %v2605_v7 }
 0x616   :  { %v1822_v53 = vadd.f32 %v1820_v51, %v2598_v5  ;;  %v1863_v5 = vld [vmem:[%s2912_s4] sm:$0xff] }
 0x617   :  { %v1827_v54 = vsel %vm48_vm0, %v1823_v52, 0.0  ;;  %v2386_v1 = vpack.c.bf16 %v1864_v0, %v1863_v5 }
 0x618   :  { %1828 = vadd.xlane.f32.xlu0 %v1827_v54  ;;  %v1824_v12 = vsel %vm48_vm0, %v1822_v53, 0.0 }
 0x619   :  { %1825 = vadd.xlane.f32.xlu1 %v1824_v12  ;;  %2387 = vmatprep.subr.bf16.mxu1 %v2386_v1 }
 0x61a   :  { %2389 = vmatpush3.bf16.msra.mxu1 %v2386_v1 }
 0x61b   :  { %2391 = vmatprep.subr.bf16.mxu1 %v2390_v4 }
 0x61e   :  { %2393 = vmatpush3.bf16.msra.mxu1 %v2390_v4 }
 0x6a5   :  { %v1829_v55 = vpop.xlane.xlu0 %1828 }
 0x6a6   :  { %v1832_v56 = vmul.f32 0.03125, %v1829_v55  ;;  %v1826_v57 = vpop.xlane.xlu1 %1825 }
 0x6a7   :  { %v1831_v58 = vmul.f32 0.03125, %v1826_v57 }
 0x6a8   :  { %v1834_v59 = vsub.f32 %v1823_v52, %v1832_v56 }
 0x6a9   :  { %v1833_v60 = vsub.f32 %v1822_v53, %v1831_v58 }
 0x6aa   :  { %v1836_v61 = vmul.f32 %v1834_v59, %v1834_v59 }
 0x6ab   :  { %v1835_v62 = vmul.f32 %v1833_v60, %v1833_v60 }
 0x6ac   :  { %v1840_v63 = vsel %vm48_vm0, %v1836_v61, 0.0 }
 0x6ad   :  { %1841 = vadd.xlane.f32.xlu0 %v1840_v63  ;;  %v1837_v7 = vsel %vm48_vm0, %v1835_v62, 0.0 }
 0x6ae   :  { %1838 = vadd.xlane.f32.xlu1 %v1837_v7 }
 0x73a   :  { %v1842_v19 = vpop.xlane.xlu0 %1841 }
 0x73b   :  { %v1844_v20 = vmul.f32 0.03125, %v1842_v19  ;;  %v1839_v21 = vpop.xlane.xlu1 %1838 }
 0x73c   :  { %v1843_v22 = vmul.f32 0.03125, %v1839_v21 }
 0x73d   :  { %v1846_v23 = vadd.f32 1e-05, %v1844_v20 }
 0x73e   :  { %v1845_v24 = vadd.f32 1e-05, %v1843_v22 }
 0x73f   :  { %2465 = vrsqrt.f32 %v1846_v23 }
 0x740   :  { %2467 = vrsqrt.f32 %v1845_v24 }
 0x749   :  { %v2466_v25 = vpop.eup %2465 }
 0x74a   :  { %v2468_v27 = vpop.eup %2467  ;;  %v1850_v28 = vmul.f32 %v2466_v25, %v1834_v59 }
 0x74b   :  { %v1849_v29 = vmul.f32 %v2468_v27, %v1833_v60 }
 0x74c   :  { %v1856_v31 = vmul.f32 %v2161_v26, %v1850_v28 }
 0x74d   :  { %v1855_v32 = vmul.f32 %v2161_v26, %v1849_v29 }
 0x74e   :  { %v1862_v33 = vadd.f32 %v2162_v30, %v1856_v31 }
 0x74f   :  { %v1861_v13 = vadd.f32 %v2162_v30, %v1855_v32 }
 0x751   :  { %2356 = vmatprep.mubr.msk.f32.mxu1 %vm48_vm0, %v1861_v13 }
 0x752   :  { %2357 = vmatmul.mubr.msk.f32.vlgmr.msra.gmra.mrb[22].mxu1 %vm48_vm0, %v1862_v33 }
 0x825   :  { %v2358_v38 = vpop.f32.mrb[22].mxu1 }
 0x826   :  { %v1949_v39 = vadd.f32 %v2358_v38, %v2163_v37  ;;  %v1943_v40 = vpop.f32.mrb[23].mxu1 }
 0x827   :  { %v1944_v42 = vadd.f32 %v2163_v37, %v1943_v40 }
 0x828   :  { %v1953_v44 = vmax.f32 %v1949_v39, 0.0 }
 0x829   :  { %v1952_v43 = vmax.f32 %v1944_v42, 0.0 }
 0x82b   :  { %2375 = vmatprep.mubr.msk.f32.mxu0 %vm1966_vm3, %v1952_v43 }
 0x82c   :  { %2376 = vmatmul.mubr.msk.f32.vlgmr.msra.gmra.mrb[14].mxu0 %vm1966_vm3, %v1953_v44 }
 0x8ff   :  { %v2377_v46 = vpop.f32.mrb[14].mxu0 }
 0x900   :  { %v2045_v47 = vadd.f32 %v2377_v46, %v2166_v45  ;;  %v2039_v48 = vpop.f32.mrb[15].mxu0 }
 0x901   :  { %v2040_v8 = vadd.f32 %v2166_v45, %v2039_v48 }
 0x902   :  { %v2049_v41 = vadd.f32 %v2045_v47, %v1862_v33 }
 0x903   :  { %v2048_v49 = vadd.f32 %v2040_v8, %v1861_v13 }
 0x904   :  { %v2053_v50 = vsel %vm48_vm0, %v2049_v41, 0.0 }
 0x905   :  { %2054 = vadd.xlane.f32.xlu0 %v2053_v50  ;;  %v2050_v51 = vsel %vm48_vm0, %v2048_v49, 0.0 }
 0x906   :  { %2051 = vadd.xlane.f32.xlu1 %v2050_v51 }
 0x992   :  { %v2055_v52 = vpop.xlane.xlu0 %2054 }
 0x993   :  { %v2057_v53 = vmul.f32 0.03125, %v2055_v52  ;;  %v2052_v54 = vpop.xlane.xlu1 %2051 }
 0x994   :  { %v2056_v12 = vmul.f32 0.03125, %v2052_v54 }
 0x995   :  { %v2059_v55 = vsub.f32 %v2049_v41, %v2057_v53 }
 0x996   :  { %v2058_v56 = vsub.f32 %v2048_v49, %v2056_v12 }
 0x997   :  { %v2061_v57 = vmul.f32 %v2059_v55, %v2059_v55 }
 0x998   :  { %v2060_v58 = vmul.f32 %v2058_v56, %v2058_v56 }
 0x999   :  { %v2065_v59 = vsel %vm48_vm0, %v2061_v57, 0.0 }
 0x99a   :  { %2066 = vadd.xlane.f32.xlu0 %v2065_v59  ;;  %v2062_v60 = vsel %vm48_vm0, %v2060_v58, 0.0 }
 0x99b   :  { %2063 = vadd.xlane.f32.xlu1 %v2062_v60 }
 0x99c   :  { %2484 = shalt.err (!%p2481_p4)
}
 0x99d   :  { %s2485_s15 = scalar_lea.hbm %s2916_s8, 1024 }
 0x99e   :  { %p2486_p5 = scmp.ne.s32.totalorder %s2916_s8, %s2485_s15  ;;  %p2489_p6 = scmp.lt.u32.totalorder %s2485_s15, %s2916_s8 }
 0x9a0   :  { %p2491_p7 = pnand %p2489_p6, %p2486_p5 }
 0x9a2   :  { %2494 = shalt.err (!%p2491_p7)
}
 0x9a3   :  { %s2535_s18 = smov 128   ;;  %s2536_s4 = smov 8   ;;  %v2169_v2 = vld [vmem:[%s2914_s6 + $0x6] ss:$0 sm:$0xff]  ;;  %v2170_v6 = vld [vmem:[%s2914_s6 + $0x7] ss:$0 sm:$0xff] }
 0x9a4   :  { %2113 = dma.vmem_to_hbm [thread:$0]  %s2108_s11, 1024, %s2916_s8, [#allocation5], %s2535_s18, %s2535_s18, %s2536_s4  }
 0x9a5   :  { %s2537_s8 = smov [#allocation2]  }
 0x9a6   :  { %s2095_s24 = sshll.u32 %s2537_s8, 4  ;;  %s2096_s24 = int_to_ptr.vmem [resolvable:$true] %s2095_s24 }
 0x9a7   :  { %s2495_s25 = scalar_lea.vmem %s2096_s24, 256  ;;  %p2500_p9 = scmp.lt.s32.totalorder %s2096_s24, %s2096_s24 }
 0x9a8   :  { %p2496_p8 = scmp.ne.s32.totalorder %s2096_s24, %s2495_s25  ;;  %p2501_p10 = scmp.lt.s32.totalorder %s2495_s25, %s2495_s25 }
 0x9aa   :  { %p2502_p11 = por %p2501_p10, %p2500_p9 }
 0x9ac   :  { %p2503_p12 = pnand %p2502_p11, %p2496_p8 }
 0xa27   :  { %v2067_v61 = vpop.xlane.xlu0 %2066 }
 0xa28   :  { %v2069_v62 = vmul.f32 0.03125, %v2067_v61  ;;  %v2064_v63 = vpop.xlane.xlu1 %2063 }
 0xa29   :  { %v2068_v7 = vmul.f32 0.03125, %v2064_v63 }
 0xa2a   :  { %v2071_v5 = vadd.f32 1e-05, %v2069_v62 }
 0xa2b   :  { %v2070_v0 = vadd.f32 1e-05, %v2068_v7 }
 0xa2c   :  { %2469 = vrsqrt.f32 %v2071_v5 }
 0xa2d   :  { %2471 = vrsqrt.f32 %v2070_v0 }
 0xa36   :  { %v2470_v1 = vpop.eup %2469 }
 0xa37   :  { %v2472_v3 = vpop.eup %2471  ;;  %v2075_v4 = vmul.f32 %v2470_v1, %v2059_v55 }
 0xa38   :  { %v2074_v9 = vmul.f32 %v2472_v3, %v2058_v56 }
 0xa39   :  { %v2081_v10 = vmul.f32 %v2169_v2, %v2075_v4 }
 0xa3a   :  { %v2080_v11 = vmul.f32 %v2169_v2, %v2074_v9 }
 0xa3b   :  { %v2087_v14 = vadd.f32 %v2170_v6, %v2081_v10 }
 0xa3c   :  { %v2086_v15 = vadd.f32 %v2170_v6, %v2080_v11 }
 0xa3d   :  { %2089 = vst.msk [vmem:[#allocation2 + $0x8] sm:$0xff] %vm48_vm0, %v2087_v14 }
 0xa3e   :  { %2088 = vst.msk [vmem:[#allocation2] sm:$0xff] %vm48_vm0, %v2086_v15 }
 0xa3f   :  { %2506 = shalt.err (!%p2503_p12)
}
 0xa40   :  { %s2507_s27 = scalar_lea.hbm %s2915_s7, 256 }
 0xa41   :  { %p2508_p13 = scmp.ne.s32.totalorder %s2915_s7, %s2507_s27  ;;  %p2511_p0 = scmp.lt.u32.totalorder %s2507_s27, %s2915_s7 }
 0xa43   :  { %p2513_p1 = pnand %p2511_p0, %p2508_p13 }
 0xa45   :  { %2516 = shalt.err (!%p2513_p1)
}
 0xa46   :  { %2101 = dma.vmem_to_hbm [thread:$0]  %s2096_s24, 256, %s2915_s7, [#allocation3], %s2535_s18, %s2535_s18, %s2536_s4  }
 0xa47   :  { %2517 = dma.done.wait [#allocation3], 256  }
 0xa48   :  { %2518 = vsyncadd [#allocation3], 4294967040 }
 0xa49   :  { %2519 = dma.done.wait [#allocation5], 1024  }
 0xa4a   :  { %2520 = vsyncadd [#allocation5], 4294966272 }
 0xa4b   :  { %2120 = vsyncpa [#allocation3], 1 }
 0xa4c   :  { %2121 = vsyncpa [#allocation5], 1 }

</bundles_post_ra>
